<compile_context>
chip_gen: v6e
topology: v6e:2x2x1
jax: 0.10.0
libtpu: 0.0.40
codegen_flags: <defaults>
</compile_context>

<pallas_src>
import math

import jax
import jax.numpy as jnp
from jax.experimental import pallas as pl
from jax.experimental.pallas import tpu as pltpu


_SQRT_2_OVER_PI = math.sqrt(2.0 / math.pi)


def _gelu_tanh(x):
    # TODO(synk): PyTorch nn.GELU() defaults to the exact erf formulation; the tanh
    # approximation is used here so the activation lowers to guaranteed VPU/EUP ops.
    x3 = x * x * x
    return 0.5 * x * (1.0 + jnp.tanh(_SQRT_2_OVER_PI * (x + 0.044715 * x3)))


def _gcn_layer_kernel(x_ref, w_ref, a_ref, o_ref):
    # x_ref: (N, D) node features of this batch element      (VMEM)
    # w_ref: (D, D) shared layer weight (grid-invariant)      (VMEM, resident)
    # a_ref: (N, N) normalized transposed adjacency           (VMEM)
    # o_ref: (N, D) output features                           (VMEM)
    h = jnp.dot(x_ref[...], w_ref[...], preferred_element_type=jnp.float32)
    y = jnp.dot(a_ref[...], h, preferred_element_type=jnp.float32)
    o_ref[...] = _gelu_tanh(y).astype(o_ref.dtype)


def _gcn_layer_dropout_kernel(x_ref, w_ref, a_ref, m_ref, o_ref):
    # Same as above with the (already scaled) inverted-dropout mask fused in.
    h = jnp.dot(x_ref[...], w_ref[...], preferred_element_type=jnp.float32)
    y = jnp.dot(a_ref[...], h, preferred_element_type=jnp.float32)
    o_ref[...] = (_gelu_tanh(y) * m_ref[...]).astype(o_ref.dtype)


def gcn_layer_forward(x, w, norm_adj_t, drop_mask=None):
    """One fused GCNLayer forward: gelu(norm_adj_t @ (x @ w)) [* drop_mask]."""
    B, N, D = x.shape

    in_specs = [
        pl.BlockSpec((None, N, D), lambda b: (b, 0, 0)),   # x     : per-batch block
        pl.BlockSpec((D, D), lambda b: (0, 0)),            # w     : grid-invariant, VMEM-resident
        pl.BlockSpec((None, N, N), lambda b: (b, 0, 0)),   # adj_t : per-batch block
    ]
    args = (x, w, norm_adj_t)
    kernel = _gcn_layer_kernel
    if drop_mask is not None:
        in_specs.append(pl.BlockSpec((None, N, D), lambda b: (b, 0, 0)))
        args = args + (drop_mask,)
        kernel = _gcn_layer_dropout_kernel

    return pl.pallas_call(
        kernel,
        out_shape=jax.ShapeDtypeStruct((B, N, D), x.dtype),
        grid_spec=pltpu.PrefetchScalarGridSpec(
            num_scalar_prefetch=0,
            grid=(B,),
            in_specs=in_specs,
            out_specs=pl.BlockSpec((None, N, D), lambda b: (b, 0, 0)),
        ),
        compiler_params=pltpu.CompilerParams(
            # batch elements are independent -> let v7x's two TensorCores split them
            dimension_semantics=("parallel",),
        ),
    )(*args)


def gcn_forward(inputs, adj, weights, dropout_p, *, training=False, rng_key=None):
    """JAX/Pallas equivalent of GCN.forward (forward values only)."""
    B, N, _ = adj.shape
    D = inputs.shape[-1]

    # --- one-time adjacency normalization (reused by every layer) ---
    in_degree = jnp.maximum(jnp.sum(adj, axis=1), jnp.ones((), adj.dtype))   # (B, N)
    norm_adj_t = jnp.swapaxes(adj, 1, 2) / in_degree[:, :, None]             # (B, N, N)

    use_dropout = bool(training) and dropout_p > 0.0
    if use_dropout:
        keys = jax.random.split(rng_key, len(weights))

    out = inputs
    for li, w in enumerate(weights):
        mask = None
        if use_dropout:
            keep = jax.random.bernoulli(keys[li], 1.0 - dropout_p, (B, N, D))
            mask = keep.astype(inputs.dtype) / jnp.asarray(1.0 - dropout_p, inputs.dtype)
        out = gcn_layer_forward(out, w, norm_adj_t, mask)
    return out


def gcn_reference(inputs, adj, weights, dropout_p, training, rng_key):
    """Pure-JAX reference (same mask construction / same GELU form)."""
    in_degree = jnp.maximum(jnp.sum(adj, axis=1), 1.0)
    norm_adj_t = jnp.swapaxes(adj, 1, 2) / in_degree[:, :, None]
    use_dropout = bool(training) and dropout_p > 0.0
    if use_dropout:
        keys = jax.random.split(rng_key, len(weights))
    out = inputs
    for li, w in enumerate(weights):
        h = jnp.einsum("bnd,de->bne", out, w, precision=jax.lax.Precision.HIGHEST)
        y = jnp.einsum("bjn,bnd->bjd", norm_adj_t, h, precision=jax.lax.Precision.HIGHEST)
        y = _gelu_tanh(y)
        if use_dropout:
            keep = jax.random.bernoulli(keys[li], 1.0 - dropout_p, y.shape)
            mask = keep.astype(y.dtype) / jnp.asarray(1.0 - dropout_p, y.dtype)
            y = y * mask
        out = y
    return out


if __name__ == "__main__":
    # small, MXU/lane-aligned shapes consistent with the module
    B, N, D = 2, 128, 128      # batch, n_node, hidden (input_size == output_size)
    NUM_LAYERS = 2             # GCN builds num_layers + 1 = 3 GCNLayers
    DROPOUT = 0.1

    key = jax.random.PRNGKey(0)
    k_x, k_adj, k_w, k_drop = jax.random.split(key, 4)

    inputs = jax.random.normal(k_x, (B, N, D), dtype=jnp.float32)

    # random 0/1 adjacency; identity self-loops already added (as the module assumes)
    adj = (jax.random.uniform(k_adj, (B, N, N)) < 0.1).astype(jnp.float32)
    adj = jnp.maximum(adj, jnp.eye(N, dtype=jnp.float32)[None])

    # xavier_uniform-style deterministic "parameters" for each layer's w
    # TODO(synk): the module's nn.init.normal_(self.w_vs, ...) references an undefined
    # attribute (would raise in PyTorch); ignored here since it never affects forward.
    limit = math.sqrt(6.0 / (D + D))
    w_keys = jax.random.split(k_w, NUM_LAYERS + 1)
    weights = [
        jax.random.uniform(kk, (D, D), jnp.float32, -limit, limit) for kk in w_keys
    ]

    # mirror the module's sanity assert on the normalized adjacency
    in_deg = jnp.maximum(jnp.sum(adj, axis=1), 1.0)
    norm_adj_t = jnp.swapaxes(adj, 1, 2) / in_deg[:, :, None]
    row_sums = norm_adj_t.sum(2)
    assert bool(
        jnp.all((jnp.abs(row_sums - 1.0) < 1e-5) | (jnp.abs(row_sums) < 1e-5))
    )

    # --- eval path (dropout inactive; mask-free kernel) ---
    out_eval = gcn_forward(inputs, adj, weights, DROPOUT, training=False)
    out_eval = jax.block_until_ready(out_eval)
    ref_eval = gcn_reference(inputs, adj, weights, DROPOUT, False, None)
    assert out_eval.shape == (B, N, D)
    assert jnp.allclose(out_eval, ref_eval, atol=1e-3, rtol=1e-3)

    # --- training path (inverted dropout fused into the kernel) ---
    out_train = gcn_forward(
        inputs, adj, weights, DROPOUT, training=True, rng_key=k_drop
    )
    out_train = jax.block_until_ready(out_train)
    ref_train = gcn_reference(inputs, adj, weights, DROPOUT, True, k_drop)
    assert jnp.allclose(out_train, ref_train, atol=1e-3, rtol=1e-3)

    print("KERNEL_OK")
</pallas_src>

<mosaic_0001>
module attributes {stable_mosaic.version = 11 : i64} {
  func.func @_gcn_layer_kernel(%arg0: i32, %arg1: memref<1x128x128xf32, #tpu.memory_space<vmem>>, %arg2: memref<128x128xf32, #tpu.memory_space<vmem>>, %arg3: memref<1x128x128xf32, #tpu.memory_space<vmem>>, %arg4: memref<1x128x128xf32, #tpu.memory_space<vmem>>) attributes {dimension_semantics = [#tpu.dimension_semantics<parallel>], iteration_bounds = array<i64: 2>, scalar_prefetch = 0 : i64, scratch_operands = 0 : i64, tpu.core_type = #tpu.core_type<tc>, window_params = [{transform_indices = @transform_0, window_bounds = array<i64: 1, 128, 128>}, {pipeline_mode = #tpu.pipeline_mode<synchronous>, transform_indices = @transform_1, window_bounds = array<i64: 128, 128>}, {transform_indices = @transform_2, window_bounds = array<i64: 1, 128, 128>}, {transform_indices = @transform_3, window_bounds = array<i64: 1, 128, 128>}]} {
    %c0 = arith.constant 0 : index
    %c0_0 = arith.constant 0 : index
    %c0_1 = arith.constant 0 : index
    %0 = vector.load %arg1[%c0, %c0_0, %c0_1] : memref<1x128x128xf32, #tpu.memory_space<vmem>>, vector<1x128x128xf32>
    %1 = vector.shape_cast %0 : vector<1x128x128xf32> to vector<128x128xf32>
    %c0_2 = arith.constant 0 : index
    %c0_3 = arith.constant 0 : index
    %2 = vector.load %arg2[%c0_2, %c0_3] : memref<128x128xf32, #tpu.memory_space<vmem>>, vector<128x128xf32>
    %cst = arith.constant dense<0.000000e+00> : vector<128x128xf32>
    %3 = tpu.matmul %1, %2, %cst {dimension_numbers = #tpu.dot_dimension_numbers<[1], [0], [0], [1], [0, 0, 1, 1], [], []>} : vector<128x128xf32>, vector<128x128xf32>, vector<128x128xf32> -> vector<128x128xf32>
    %c0_4 = arith.constant 0 : index
    %c0_5 = arith.constant 0 : index
    %c0_6 = arith.constant 0 : index
    %4 = vector.load %arg3[%c0_4, %c0_5, %c0_6] : memref<1x128x128xf32, #tpu.memory_space<vmem>>, vector<1x128x128xf32>
    %5 = vector.shape_cast %4 : vector<1x128x128xf32> to vector<128x128xf32>
    %cst_7 = arith.constant dense<0.000000e+00> : vector<128x128xf32>
    %6 = tpu.matmul %5, %3, %cst_7 {dimension_numbers = #tpu.dot_dimension_numbers<[1], [0], [0], [1], [0, 0, 1, 1], [], []>} : vector<128x128xf32>, vector<128x128xf32>, vector<128x128xf32> -> vector<128x128xf32>
    %7 = arith.mulf %6, %6 : vector<128x128xf32>
    %8 = arith.mulf %7, %6 : vector<128x128xf32>
    %cst_8 = arith.constant 5.000000e-01 : f32
    %9 = vector.broadcast %cst_8 : f32 to vector<128x128xf32>
    %10 = arith.mulf %9, %6 : vector<128x128xf32>
    %cst_9 = arith.constant 4.471500e-02 : f32
    %11 = vector.broadcast %cst_9 : f32 to vector<128x128xf32>
    %12 = arith.mulf %11, %8 : vector<128x128xf32>
    %13 = arith.addf %6, %12 : vector<128x128xf32>
    %cst_10 = arith.constant 0.797884583 : f32
    %14 = vector.broadcast %cst_10 : f32 to vector<128x128xf32>
    %15 = arith.mulf %14, %13 : vector<128x128xf32>
    %16 = math.tanh %15 : vector<128x128xf32>
    %cst_11 = arith.constant 1.000000e+00 : f32
    %17 = vector.broadcast %cst_11 : f32 to vector<128x128xf32>
    %18 = arith.addf %17, %16 : vector<128x128xf32>
    %19 = arith.mulf %10, %18 : vector<128x128xf32>
    %c0_12 = arith.constant 0 : index
    %c0_13 = arith.constant 0 : index
    %c0_14 = arith.constant 0 : index
    %20 = vector.load %arg4[%c0_12, %c0_13, %c0_14] : memref<1x128x128xf32, #tpu.memory_space<vmem>>, vector<1x128x128xf32>
    %21 = vector.shape_cast %20 : vector<1x128x128xf32> to vector<128x128xf32>
    %22 = vector.shape_cast %19 : vector<128x128xf32> to vector<1x128x128xf32>
    tpu.vector_store %arg4[%c0_12, %c0_13, %c0_14], %22 {strides = array<i32>} : memref<1x128x128xf32, #tpu.memory_space<vmem>>, vector<1x128x128xf32>,
    return
  }
  func.func @transform_0(%arg0: i32) -> (i32, i32, i32) {
    %c0_i32 = arith.constant 0 : i32
    %c0_i32_0 = arith.constant 0 : i32
    %c0_i32_1 = arith.constant 0 : i32
    return %arg0, %c0_i32, %c0_i32_0 : i32, i32, i32
  }
  func.func @transform_1(%arg0: i32) -> (i32, i32) {
    %c0_i32 = arith.constant 0 : i32
    %c0_i32_0 = arith.constant 0 : i32
    %c0_i32_1 = arith.constant 0 : i32
    return %c0_i32, %c0_i32_0 : i32, i32
  }
  func.func @transform_2(%arg0: i32) -> (i32, i32, i32) {
    %c0_i32 = arith.constant 0 : i32
    %c0_i32_0 = arith.constant 0 : i32
    %c0_i32_1 = arith.constant 0 : i32
    return %arg0, %c0_i32, %c0_i32_0 : i32, i32, i32
  }
  func.func @transform_3(%arg0: i32) -> (i32, i32, i32) {
    %c0_i32 = arith.constant 0 : i32
    %c0_i32_0 = arith.constant 0 : i32
    %c0_i32_1 = arith.constant 0 : i32
    return %arg0, %c0_i32, %c0_i32_0 : i32, i32, i32
  }
}

</mosaic_0001>

<bundles_post_ra>
// kernel: tpu_custom_call.1
= control target key start
LH: loop header
LB: loop body
LE: loop exit
PB: predicated region body
PF: predicated region fallthrough
CT: control target
= control target key end

     0   :  { %8 = vsyncpa [#allocation3], 0  ;;  %s1747_s0 = inlined_call_operand.hbm [shape: f32[2,128,128], index: 0, kind: input, shape index: {}]   ;;  %s1748_s1 = inlined_call_operand.hbm [shape: f32[128,128], index: 1, kind: input, shape index: {}]   ;;  %s1749_s2 = inlined_call_operand.hbm [shape: f32[2,128,128], index: 2, kind: input, shape index: {}]   ;;  %s1750_s3 = inlined_call_operand.hbm [shape: f32[2,128,128], index: 3, kind: output, shape index: {}]  }
   0x1   :  { %10 = vsyncpa [#allocation3 + $0x1], 0 }
   0x2   :  { %11 = vsyncpa [#allocation6], 0 }
   0x3   :  { %12 = vsyncpa [#allocation4], 0 }
   0x4   :  { %14 = vsyncpa [#allocation4 + $0x1], 0  ;;  %s1337_s12 = smov 0   ;;  %s1339_s13 = smov 0  }
   0x5   :  { %s1341_s14 = smov 0   ;;  %s1343_s15 = smov 0  }
   0x6 LB: > { %s1358_s16 = sadd.s32 1, %s1307_s15   ;;  %s27_s17 = sadd.s32 1, %s1303_s14  ;;  %s1307_s15 = sphi %s1343_s15, %s1770_s15   ;;  %s1303_s14 = sphi %s1341_s14, %s1769_s14   ;;  %s1299_s13 = sphi %s1339_s13, %s1768_s13   ;;  %s1295_s12 = sphi %s1337_s12, %s1767_s12  }
   0x7   : > { %s24_s18 = ssub.s32 %s1307_s15, %s1358_s16  ;;  %p34_p0 = scmp.ne.s32.totalorder %s1303_s14, %s1299_s13 }
   0x8   : > { %p25_p1 = scmp.eq.s32.totalorder %s24_s18, 0  ;;  %p35_p2 = scmp.eq.s32.totalorder %s1307_s15, 0 }
   0x9   : > { %p1081_p5 = scmp.lt.s32.totalorder %s1307_s15, 2  ;;  %s150_s20 = sand.u32 1, %s1307_s15  }
   0xa   : > { %s1367_s19 = scalar_select %p25_p1, %s1303_s14, %s27_s17  }
   0xb   : > { %p36_p3 = por %p35_p2, %p34_p0  ;;  %s152_s21 = sand.u32 1, %s1303_s14  }
   0xc   : > { %s1376_s22 = sshll.u32 %s152_s21, 7  ;;  %s876_s23 = sshll.u32 %s1307_s15, 11 }
   0xd   : > { %s1384_s26 = scalar_lea.hbm %s1747_s0, %s876_s23  ;;  %s154_s27 = scalar_lea.vmem [#allocation2], %s1376_s22 }
   0xe   : > { %s161_s28 = sshll.u32 %s154_s27, 4  ;;  %p1387_p6 = pnand %p1081_p5, %p36_p3  ;;  %s1391_s28 = int_to_ptr.vmem [resolvable:$true] %s161_s28 }
   0xf   : > { %s1393_s30 = scalar_lea.sflag [#allocation3], %s150_s20  ;;  %s1153_s4 = scalar_lea.hbm %s1384_s26, 2048 }
  0x10   : > { %p1154_p7 = scmp.ne.s32.totalorder %s1384_s26, %s1153_s4  ;;  %p1155_p8 = pneg %p1387_p6 }
  0x11   : > { %s1158_s7 = scalar_lea.hbm %s1747_s0, 4096  ;;  %p1159_p11 = scmp.lt.s32.totalorder %s1384_s26, %s1747_s0 }
  0x12   : > { %p1156_p9 = pnand %p1155_p8, %p1154_p7  ;;  %p1160_p12 = scmp.lt.s32.totalorder %s1158_s7, %s1153_s4 }
  0x14   : > { %p1157_p10 = pneg %p1156_p9  ;;  %p1161_p13 = por %p1160_p12, %p1159_p11 }
  0x16   : > { %p1162_p1 = pnand %p1161_p13, %p1157_p10 }
  0x18   : > { %1165 = shalt.err (!%p1162_p1)
}
  0x19   : > { %s1166_s10 = scalar_lea.vmem %s1391_s28, 2048  ;;  %s1309_s11 = smov [#allocation2]  }
  0x1a   : > { %p1167_p2 = scmp.ne.s32.totalorder %s1391_s28, %s1166_s10  ;;  %s1171_s17 = sshll.u32 %s1309_s11, 4  ;;  %s1172_s17 = int_to_ptr.vmem [resolvable:$false] %s1171_s17 }
  0x1b   : > { %s1173_s18 = scalar_lea.vmem %s1172_s17, 4096  ;;  %p1174_p7 = scmp.lt.s32.totalorder %s1391_s28, %s1172_s17 }
  0x1c   : > { %p1169_p3 = pnand %p1167_p2, %p1155_p8  ;;  %p1175_p9 = scmp.lt.s32.totalorder %s1173_s18, %s1166_s10 }
  0x1e   : > { %p1170_p5 = pneg %p1169_p3  ;;  %p1176_p4 = por %p1175_p9, %p1174_p7 }
  0x20   : > { %p1177_p11 = pnand %p1176_p4, %p1170_p5 }
  0x22   : > { %1180 = shalt.err (!%p1177_p11)
}
  0x23   : > { %s1310_s20 = smov 128   ;;  %s1311_s21 = smov 8  }
  0x24   : > { %1072 = dma.hbm_to_vmem [thread:$0]  (!%p1387_p6), %s1384_s26, 2048, %s1391_s28, %s1393_s30, %s1310_s20, %s1310_s20, %s1311_s21  }
  0x25   : > { %s175_s24 = scalar_lea.vmem [#allocation7], %s1376_s22  ;;  %s1425_s27 = sadd.s32 4294967295, %s1307_s15  }
  0x26   : > { %s182_s25 = sshll.u32 %s175_s24, 4  ;;  %s856_s4 = sadd.s32 4294967294, %s1307_s15   ;;  %s1458_s25 = int_to_ptr.vmem [resolvable:$true] %s182_s25 }
  0x27   : > { %p40_p4 = scmp.ne.s32.totalorder %s1299_s13, %s1295_s12  ;;  %p1751_p10 = scmp.eq.s32.totalorder %s1425_s27, 0 }
  0x28   : > { %p111_p12 = scmp.eq.s32.totalorder %s1425_s27, 1  ;;  %p117_p13 = scmp.eq.s32.totalorder %s856_s4, 1 }
  0x29   : > { %p1434_p1 = por %p1751_p10, %p40_p4  ;;  %p857_p2 = scmp.ge.s32.totalorder %s1307_s15, 1 }
  0x2a   : > { %p1442_p3 = por %p111_p12, %p34_p0  ;;  %p1446_p5 = por %p117_p13, %p40_p4 }
  0x2b   : > { %s1755_s5 = scalar_select %p1434_p1, 1, 0 }
  0x2c   : > { %s1756_s22 = scalar_select %p1442_p3, 1, 0 }
  0x2d   : > { %s1757_s26 = scalar_select %p1446_p5, 1, 0 }
  0x2e   : > { %p124_p7 = scmp.lt.s32.totalorder %s1307_s15, 3  ;;  %s1456_s7 = scalar_lea.hbm %s1749_s2, %s876_s23 }
  0x2f   : > { %s1312_s9 = smov [#allocation5]   ;;  %s1181_s11 = scalar_lea.hbm %s1456_s7, 2048 }
  0x30   : > { %p1460_p0 = pnand %p857_p2, %p124_p7  ;;  %s1464_s10 = sshll.u32 %s1312_s9, 4  ;;  %s137_s10 = int_to_ptr.vmem [resolvable:$true] %s1464_s10 }
  0x31   : > { %p1182_p11 = scmp.ne.s32.totalorder %s1456_s7, %s1181_s11  ;;  %s1186_s18 = scalar_lea.hbm %s1749_s2, 4096 }
  0x32   : > { %p1187_p13 = scmp.lt.s32.totalorder %s1456_s7, %s1749_s2  ;;  %p1188_p2 = scmp.lt.s32.totalorder %s1186_s18, %s1181_s11 }
  0x33   : > { %p1184_p4 = pnand %p1182_p11, %p1155_p8 }
  0x34   : > { %p1189_p7 = por %p1188_p2, %p1187_p13 }
  0x35   : > { %p1185_p12 = pneg %p1184_p4 }
  0x37   : > { %p1190_p10 = pnand %p1189_p7, %p1185_p12 }
  0x39   : > { %1193 = shalt.err (!%p1190_p10)
}
  0x3a   : > { %s1194_s28 = scalar_lea.vmem %s1458_s25, 2048  ;;  %s1313_s6 = smov [#allocation7]  }
  0x3b   : > { %p1195_p9 = scmp.ne.s32.totalorder %s1458_s25, %s1194_s28  ;;  %s1199_s9 = sshll.u32 %s1313_s6, 4  ;;  %s1200_s9 = int_to_ptr.vmem [resolvable:$false] %s1199_s9 }
  0x3c   : > { %s1201_s23 = scalar_lea.vmem %s1200_s9, 4096  ;;  %p1202_p5 = scmp.lt.s32.totalorder %s1458_s25, %s1200_s9 }
  0x3d   : > { %p1197_p11 = pnand %p1195_p9, %p1155_p8  ;;  %p1203_p3 = scmp.lt.s32.totalorder %s1201_s23, %s1194_s28 }
  0x3f   : > { %p1198_p4 = pneg %p1197_p11  ;;  %p1204_p1 = por %p1203_p3, %p1202_p5 }
  0x41   : > { %p1205_p13 = pnand %p1204_p1, %p1198_p4 }
  0x43   : > { %1208 = shalt.err (!%p1205_p13)
}
  0x44   : > { %1075 = dma.hbm_to_vmem [thread:$0]  (!%p1387_p6), %s1456_s7, 2048, %s1458_s25, %s1393_s30, %s1310_s20, %s1310_s20, %s1311_s21  }
  0x45   : > { %p1759_p8 = scmp.eq.s32.totalorder %s1425_s27, 0  ;;  %p1760_p10 = pneg %p1460_p0 }
  0x46   : > { %s1220_s11 = scalar_lea.vmem %s137_s10, 2048  ;;  %p1228_p2 = scmp.lt.s32.totalorder %s137_s10, %s137_s10 }
  0x47   : > { %p1066_p9 = pnand %p1760_p10, %p1759_p8  ;;  %p1221_p1 = scmp.ne.s32.totalorder %s137_s10, %s1220_s11 }
  0x48   : > { %p1229_p7 = scmp.lt.s32.totalorder %s1220_s11, %s1220_s11 }
  0x49   : > { %p1211_p3 = pneg %p1066_p9 }
  0x4a   : > { %p1230_p11 = por %p1229_p7, %p1228_p2 }
  0x4b   : > { %p1223_p5 = pnand %p1221_p1, %p1211_p3 }
  0x4d   : > { %p1224_p12 = pneg %p1223_p5 }
  0x4f   : > { %p1231_p4 = pnand %p1230_p11, %p1224_p12 }
  0x51   : > { %1234 = shalt.err (!%p1231_p4)
}
  0x52   : > { %1068 = dma.hbm_to_vmem [thread:$0]  (!%p1066_p9), %s1748_s1, 2048, %s137_s10, [#allocation6], %s1310_s20, %s1310_s20, %s1311_s21  }
  0x53   : > { %194 = sbr.rel (%p1460_p0) target bundleno = 646 (0x286), region = 32  ;;  %s196_s25 = sand.u32 (!%p1460_p0), 1, %s1425_s27  }
  0x54   : > { %s198_s7 = sand.u32 (!%p1460_p0), 1, %s1299_s13   ;;  %s197_s18 = scalar_lea.sflag (!%p1460_p0), [#allocation3], %s196_s25 }
  0x55   : > { %s1512_s17 = sshll.u32 (!%p1460_p0), %s198_s7, 7  ;;  %p1761_p6 = scmp.ne.s32.totalorder (!%p1460_p0), %s1755_s5, 0 }
  0x56   : > { %s1515_s24 = scalar_lea.vmem (!%p1460_p0), [#allocation2], %s1512_s17 }
  0x58   : > { %1278 = dma.done.wait (%p1761_p6), %s197_s18, 2048  }
  0x59   : > { %1280 = vsyncadd (%p1761_p6), %s197_s18, 4294965248  ;;  %p1762_p0 = scmp.eq.s32.totalorder %s1425_s27, 0 }
  0x5b   : > { %1282 = dma.done.wait (%p1762_p0), [#allocation6], 2048   ;;  %p1763_p13 = pmov %p1762_p0 }
  0x5c   : > { %s1526_s20 = scalar_lea.vmem [#allocation7], %s1512_s17 }
  0x5d   : > { %1284 = vsyncadd (%p1763_p13), [#allocation6], 4294965248 }
  0x5e   : > { %1286 = dma.done.wait (%p1761_p6), %s197_s18, 2048  }
  0x5f   : > { %1288 = vsyncadd (%p1761_p6), %s197_s18, 4294965248  ;;  %v272_v0 = vld [vmem:[#allocation5 + $0x78] sm:$0xff]  ;;  %v271_v1 = vld [vmem:[#allocation5 + $0x70] sm:$0xff]  ;;  %s1649_s21 = scalar_lea.vmem [#allocation8], %s1512_s17  ;;  %s878_s5 = sshll.u32 %s1425_s27, 11 }
  0x60   : > { %943 = vmatprep.subr.mxu0 %v272_v0  ;;  %v270_v2 = vld [vmem:[#allocation5 + $0x68] sm:$0xff]  ;;  %v269_v3 = vld [vmem:[#allocation5 + $0x60] sm:$0xff]  ;;  %v268_v5 = vld [vmem:[#allocation5 + $0x58] sm:$0xff]  ;;  %s753_s8 = sshll.u32 %s1649_s21, 4  ;;  %s1698_s28 = scalar_lea.hbm %s1750_s3, %s878_s5  ;;  %s1700_s8 = int_to_ptr.vmem [resolvable:$true] %s753_s8 }
  0x61   : > { %944 = vmatpush3.msra.mxu0 %v272_v0  ;;  %v241_v4 = vld [vmem:[%s1515_s24] sm:$0xff]  ;;  %v267_v6 = vld [vmem:[#allocation5 + $0x50] sm:$0xff]  ;;  %v266_v7 = vld [vmem:[#allocation5 + $0x48] sm:$0xff]  ;;  %s1706_s27 = scalar_lea.sflag [#allocation4], %s198_s7  ;;  %s1235_s6 = scalar_lea.vmem %s1700_s8, 2048 }
  0x62   : > { %945 = vmatprep.subr.mxu0 %v271_v1  ;;  %975 = vmatprep.mubr.f32.mxu0 %v241_v4  ;;  %v265_v8 = vld [vmem:[#allocation5 + $0x40] sm:$0xff]  ;;  %v264_v9 = vld [vmem:[#allocation5 + $0x38] sm:$0xff]  ;;  %v263_v10 = vld [vmem:[#allocation5 + $0x30] sm:$0xff]  ;;  %p1236_p8 = scmp.ne.s32.totalorder %s1700_s8, %s1235_s6  ;;  %p1764_p10 = scmp.ne.s32.totalorder %s1756_s22, 0 }
  0x63   : > { %946 = vmatpush3.msra.mxu0 %v271_v1  ;;  %v262_v11 = vld [vmem:[#allocation5 + $0x28] sm:$0xff]  ;;  %v261_v12 = vld [vmem:[#allocation5 + $0x20] sm:$0xff]  ;;  %v260_v13 = vld [vmem:[#allocation5 + $0x18] sm:$0xff]  ;;  %s1314_s9 = smov [#allocation8]  }
  0x64   : > { %947 = vmatprep.subr.mxu0 %v270_v2  ;;  %v259_v14 = vld [vmem:[#allocation5 + $0x10] sm:$0xff]  ;;  %v258_v15 = vld [vmem:[#allocation5 + $0x8] sm:$0xff]  ;;  %v257_v16 = vld [vmem:[#allocation5] sm:$0xff]  ;;  %p1237_p9 = pnand %p1236_p8, %p1764_p10  ;;  %s1239_s23 = sshll.u32 %s1314_s9, 4  ;;  %s1240_s23 = int_to_ptr.vmem [resolvable:$false] %s1239_s23 }
  0x65   : > { %948 = vmatpush3.msra.mxu0 %v270_v2  ;;  %v242_v17 = vld [vmem:[%s1515_s24 + $0x8] sm:$0xff]  ;;  %v243_v18 = vld [vmem:[%s1515_s24 + $0x10] sm:$0xff]  ;;  %v244_v19 = vld [vmem:[%s1515_s24 + $0x18] sm:$0xff]  ;;  %s1241_s11 = scalar_lea.vmem %s1240_s23, 4096  ;;  %p1242_p1 = scmp.lt.s32.totalorder %s1700_s8, %s1240_s23 }
  0x66   : > { %949 = vmatprep.subr.mxu0 %v269_v3  ;;  %v245_v20 = vld [vmem:[%s1515_s24 + $0x20] sm:$0xff]  ;;  %v246_v21 = vld [vmem:[%s1515_s24 + $0x28] sm:$0xff]  ;;  %v247_v22 = vld [vmem:[%s1515_s24 + $0x30] sm:$0xff]  ;;  %p1238_p3 = pneg %p1237_p9  ;;  %p1243_p5 = scmp.lt.s32.totalorder %s1241_s11, %s1235_s6 }
  0x67   : > { %950 = vmatpush3.msra.mxu0 %v269_v3  ;;  %v248_v23 = vld [vmem:[%s1515_s24 + $0x38] sm:$0xff]  ;;  %v249_v24 = vld [vmem:[%s1515_s24 + $0x40] sm:$0xff]  ;;  %v250_v25 = vld [vmem:[%s1515_s24 + $0x48] sm:$0xff] }
  0x68   : > { %951 = vmatprep.subr.mxu0 %v268_v5  ;;  %v251_v26 = vld [vmem:[%s1515_s24 + $0x50] sm:$0xff]  ;;  %v252_v27 = vld [vmem:[%s1515_s24 + $0x58] sm:$0xff]  ;;  %v253_v28 = vld [vmem:[%s1515_s24 + $0x60] sm:$0xff]  ;;  %p1244_p12 = por %p1243_p5, %p1242_p1 }
  0x69   : > { %952 = vmatpush3.msra.mxu0 %v268_v5  ;;  %v254_v29 = vld [vmem:[%s1515_s24 + $0x68] sm:$0xff]  ;;  %v255_v30 = vld [vmem:[%s1515_s24 + $0x70] sm:$0xff]  ;;  %v256_v31 = vld [vmem:[%s1515_s24 + $0x78] sm:$0xff] }
  0x6a   : > { %953 = vmatprep.subr.mxu0 %v267_v6  ;;  %v418_v32 = vld [vmem:[%s1526_s20] sm:$0xff]  ;;  %v419_v49 = vld [vmem:[%s1526_s20 + $0x8] sm:$0xff]  ;;  %v420_v50 = vld [vmem:[%s1526_s20 + $0x10] sm:$0xff]  ;;  %p1245_p2 = pnand %p1244_p12, %p1238_p3 }
  0x6b   : > { %954 = vmatpush3.msra.mxu0 %v267_v6  ;;  %1031 = vmatprep.mubr.f32.mxu1 %v418_v32  ;;  %v421_v51 = vld [vmem:[%s1526_s20 + $0x18] sm:$0xff]  ;;  %v422_v52 = vld [vmem:[%s1526_s20 + $0x20] sm:$0xff]  ;;  %v423_v53 = vld [vmem:[%s1526_s20 + $0x28] sm:$0xff] }
  0x6c   : > { %955 = vmatprep.subr.mxu0 %v266_v7  ;;  %v424_v54 = vld [vmem:[%s1526_s20 + $0x30] sm:$0xff]  ;;  %v425_v55 = vld [vmem:[%s1526_s20 + $0x38] sm:$0xff]  ;;  %v426_v56 = vld [vmem:[%s1526_s20 + $0x40] sm:$0xff] }
  0x6d   : > { %956 = vmatpush3.msra.mxu0 %v266_v7  ;;  %v427_v57 = vld [vmem:[%s1526_s20 + $0x48] sm:$0xff]  ;;  %v428_v58 = vld [vmem:[%s1526_s20 + $0x50] sm:$0xff]  ;;  %v429_v59 = vld [vmem:[%s1526_s20 + $0x58] sm:$0xff] }
  0x6e   : > { %957 = vmatprep.subr.mxu0 %v265_v8  ;;  %v430_v60 = vld [vmem:[%s1526_s20 + $0x60] sm:$0xff]  ;;  %v431_v61 = vld [vmem:[%s1526_s20 + $0x68] sm:$0xff]  ;;  %v432_v62 = vld [vmem:[%s1526_s20 + $0x70] sm:$0xff] }
  0x6f   : > { %958 = vmatpush3.msra.mxu0 %v265_v8  ;;  %v433_v63 = vld [vmem:[%s1526_s20 + $0x78] sm:$0xff] }
  0x70   : > { %959 = vmatprep.subr.mxu0 %v264_v9 }
  0x71   : > { %960 = vmatpush3.msra.mxu0 %v264_v9 }
  0x72   : > { %961 = vmatprep.subr.mxu0 %v263_v10 }
  0x73   : > { %962 = vmatpush3.msra.mxu0 %v263_v10 }
  0x74   : > { %963 = vmatprep.subr.mxu0 %v262_v11 }
  0x75   : > { %964 = vmatpush3.msra.mxu0 %v262_v11 }
  0x76   : > { %965 = vmatprep.subr.mxu0 %v261_v12 }
  0x77   : > { %966 = vmatpush3.msra.mxu0 %v261_v12 }
  0x78   : > { %967 = vmatprep.subr.mxu0 %v260_v13 }
  0x79   : > { %968 = vmatpush3.msra.mxu0 %v260_v13 }
  0x7a   : > { %969 = vmatprep.subr.mxu0 %v259_v14 }
  0x7b   : > { %970 = vmatpush3.msra.mxu0 %v259_v14 }
  0x7c   : > { %971 = vmatprep.subr.mxu0 %v258_v15 }
  0x7d   : > { %972 = vmatpush3.msra.mxu0 %v258_v15 }
  0x7e   : > { %973 = vmatprep.subr.mxu0 %v257_v16 }
  0x7f   : > { %974 = vmatpush3.msra.mxu0 %v257_v16 }
  0x80   : > { %976 = vmatmul.mubr.f32.vlgmr.msra.gmra.mxu0 %v242_v17 }
  0x81   : > { %978 = vmatprep.mubr.f32.mxu0 %v243_v18 }
  0x84   : > { %979 = vmatmul.mubr.f32.gmra.mxu0 %v244_v19 }
  0x85   : > { %981 = vmatprep.mubr.f32.mxu0 %v245_v20 }
  0x88   : > { %982 = vmatmul.mubr.f32.gmra.mxu0 %v246_v21 }
  0x89   : > { %984 = vmatprep.mubr.f32.mxu0 %v247_v22 }
  0x8c   : > { %985 = vmatmul.mubr.f32.gmra.mxu0 %v248_v23 }
  0x8d   : > { %987 = vmatprep.mubr.f32.mxu0 %v249_v24 }
  0x90   : > { %988 = vmatmul.mubr.f32.gmra.mxu0 %v250_v25 }
  0x91   : > { %990 = vmatprep.mubr.f32.mxu0 %v251_v26 }
  0x94   : > { %991 = vmatmul.mubr.f32.gmra.mxu0 %v252_v27 }
  0x95   : > { %993 = vmatprep.mubr.f32.mxu0 %v253_v28 }
  0x98   : > { %994 = vmatmul.mubr.f32.gmra.mxu0 %v254_v29 }
  0x99   : > { %996 = vmatprep.mubr.f32.mxu0 %v255_v30 }
  0x9c   : > { %997 = vmatmul.mubr.f32.gmra.mxu0 %v256_v31 }
 0x140   : > { %v977_v33 = vpop.f32.mrf.mxu0 }
 0x142   : > { %v339_v34 = vpop.f32.mrf.mxu0 }
 0x144   : > { %v980_v35 = vpop.f32.mrf.mxu0 }
 0x146   : > { %v349_v36 = vpop.f32.mrf.mxu0 }
 0x148   : > { %v983_v37 = vpop.f32.mrf.mxu0 }
 0x14a   : > { %v359_v38 = vpop.f32.mrf.mxu0 }
 0x14c   : > { %v986_v39 = vpop.f32.mrf.mxu0 }
 0x14e   : > { %v369_v40 = vpop.f32.mrf.mxu0 }
 0x150   : > { %v989_v41 = vpop.f32.mrf.mxu0 }
 0x152   : > { %v379_v42 = vpop.f32.mrf.mxu0 }
 0x154   : > { %v992_v43 = vpop.f32.mrf.mxu0 }
 0x156   : > { %v389_v44 = vpop.f32.mrf.mxu0 }
 0x158   : > { %v995_v45 = vpop.f32.mrf.mxu0 }
 0x15a   : > { %v399_v46 = vpop.f32.mrf.mxu0 }
 0x15c   : > { %v998_v47 = vpop.f32.mrf.mxu0 }
 0x15d   : > { %999 = vmatprep.subr.mxu1 %v998_v47 }
 0x15e   : > { %v409_v48 = vpop.f32.mrf.mxu0  ;;  %1000 = vmatpush3.msra.mxu1 %v998_v47 }
 0x15f   : > { %1001 = vmatprep.subr.mxu1 %v409_v48 }
 0x160   : > { %1002 = vmatpush3.msra.mxu1 %v409_v48 }
 0x161   : > { %1003 = vmatprep.subr.mxu1 %v995_v45 }
 0x162   : > { %1004 = vmatpush3.msra.mxu1 %v995_v45 }
 0x163   : > { %1005 = vmatprep.subr.mxu1 %v399_v46 }
 0x164   : > { %1006 = vmatpush3.msra.mxu1 %v399_v46 }
 0x165   : > { %1007 = vmatprep.subr.mxu1 %v992_v43 }
 0x166   : > { %1008 = vmatpush3.msra.mxu1 %v992_v43 }
 0x167   : > { %1009 = vmatprep.subr.mxu1 %v389_v44 }
 0x168   : > { %1010 = vmatpush3.msra.mxu1 %v389_v44 }
 0x169   : > { %1011 = vmatprep.subr.mxu1 %v989_v41 }
 0x16a   : > { %1012 = vmatpush3.msra.mxu1 %v989_v41 }
 0x16b   : > { %1013 = vmatprep.subr.mxu1 %v379_v42 }
 0x16c   : > { %1014 = vmatpush3.msra.mxu1 %v379_v42 }
 0x16d   : > { %1015 = vmatprep.subr.mxu1 %v986_v39 }
 0x16e   : > { %1016 = vmatpush3.msra.mxu1 %v986_v39 }
 0x16f   : > { %1017 = vmatprep.subr.mxu1 %v369_v40 }
 0x170   : > { %1018 = vmatpush3.msra.mxu1 %v369_v40 }
 0x171   : > { %1019 = vmatprep.subr.mxu1 %v983_v37 }
 0x172   : > { %1020 = vmatpush3.msra.mxu1 %v983_v37 }
 0x173   : > { %1021 = vmatprep.subr.mxu1 %v359_v38 }
 0x174   : > { %1022 = vmatpush3.msra.mxu1 %v359_v38 }
 0x175   : > { %1023 = vmatprep.subr.mxu1 %v980_v35 }
 0x176   : > { %1024 = vmatpush3.msra.mxu1 %v980_v35 }
 0x177   : > { %1025 = vmatprep.subr.mxu1 %v349_v36 }
 0x178   : > { %1026 = vmatpush3.msra.mxu1 %v349_v36 }
 0x179   : > { %1027 = vmatprep.subr.mxu1 %v977_v33 }
 0x17a   : > { %1028 = vmatpush3.msra.mxu1 %v977_v33 }
 0x17b   : > { %1029 = vmatprep.subr.mxu1 %v339_v34 }
 0x17c   : > { %1030 = vmatpush3.msra.mxu1 %v339_v34 }
 0x17d   : > { %1032 = vmatmul.mubr.f32.vlgmr.msra.gmra.mxu1 %v419_v49 }
 0x17e   : > { %1034 = vmatprep.mubr.f32.mxu1 %v420_v50 }
 0x181   : > { %1035 = vmatmul.mubr.f32.gmra.mxu1 %v421_v51 }
 0x182   : > { %1037 = vmatprep.mubr.f32.mxu1 %v422_v52 }
 0x185   : > { %1038 = vmatmul.mubr.f32.gmra.mxu1 %v423_v53 }
 0x186   : > { %1040 = vmatprep.mubr.f32.mxu1 %v424_v54 }
 0x189   : > { %1041 = vmatmul.mubr.f32.gmra.mxu1 %v425_v55 }
 0x18a   : > { %1043 = vmatprep.mubr.f32.mxu1 %v426_v56 }
 0x18d   : > { %1044 = vmatmul.mubr.f32.gmra.mxu1 %v427_v57 }
 0x18e   : > { %1046 = vmatprep.mubr.f32.mxu1 %v428_v58 }
 0x191   : > { %1047 = vmatmul.mubr.f32.gmra.mxu1 %v429_v59 }
 0x192   : > { %1049 = vmatprep.mubr.f32.mxu1 %v430_v60 }
 0x195   : > { %1050 = vmatmul.mubr.f32.gmra.mxu1 %v431_v61 }
 0x196   : > { %1052 = vmatprep.mubr.f32.mxu1 %v432_v62 }
 0x199   : > { %1053 = vmatmul.mubr.f32.gmra.mxu1 %v433_v63 }
 0x23d   : > { %v1564_v0 = vpop.f32.mrf.mxu1 }
 0x23e   : > { %v580_v1 = vmul.f32 %v1564_v0, %v1564_v0  ;;  %v612_v61 = vmul.f32 0.5, %v1564_v0 }
 0x23f   : > { %v1568_v2 = vpop.f32.mrf.mxu1 }
 0x240   : > { %v596_v3 = vmul.f32 %v1564_v0, %v580_v1  ;;  %v579_v4 = vmul.f32 %v1568_v2, %v1568_v2 }
 0x241   : > { %v1573_v5 = vpop.f32.mrf.mxu1 }
 0x242   : > { %v628_v6 = vmul.f32 0.044715, %v596_v3  ;;  %v595_v7 = vmul.f32 %v579_v4, %v1568_v2  ;;  %v582_v8 = vmul.f32 %v1573_v5, %v1573_v5 }
 0x243   : > { %v1578_v9 = vpop.f32.mrf.mxu1 }
 0x244   : > { %v644_v10 = vadd.f32 %v1564_v0, %v628_v6  ;;  %v627_v11 = vmul.f32 0.044715, %v595_v7  ;;  %v598_v12 = vmul.f32 %v1573_v5, %v582_v8  ;;  %v581_v13 = vmul.f32 %v1578_v9, %v1578_v9 }
 0x245   : > { %v1584_v14 = vpop.f32.mrf.mxu1  ;;  %v611_v8 = vmul.f32 0.5, %v1568_v2 }
 0x246   : > { %v660_v15 = vmul.f32 0.7978846, %v644_v10  ;;  %v643_v16 = vadd.f32 %v627_v11, %v1568_v2  ;;  %v630_v17 = vmul.f32 0.044715, %v598_v12  ;;  %v597_v18 = vmul.f32 %v581_v13, %v1578_v9 }
 0x247   : > { %v584_v19 = vmul.f32 %v1584_v14, %v1584_v14  ;;  %v1590_v20 = vpop.f32.mrf.mxu1 }
 0x248   : > { %1121 = vtanh.f32 %v660_v15  ;;  %v659_v21 = vmul.f32 0.7978846, %v643_v16  ;;  %v646_v22 = vadd.f32 %v1573_v5, %v630_v17  ;;  %v629_v23 = vmul.f32 0.044715, %v597_v18 }
 0x249   : > { %v600_v24 = vmul.f32 %v1584_v14, %v584_v19  ;;  %v583_v25 = vmul.f32 %v1590_v20, %v1590_v20  ;;  %v1596_v26 = vpop.f32.mrf.mxu1 }
 0x24a   : > { %1123 = vtanh.f32 %v659_v21  ;;  %v662_v27 = vmul.f32 0.7978846, %v646_v22  ;;  %v645_v28 = vadd.f32 %v629_v23, %v1578_v9  ;;  %v586_v29 = vmul.f32 %v1596_v26, %v1596_v26 }
 0x24b   : > { %v632_v30 = vmul.f32 0.044715, %v600_v24  ;;  %v599_v31 = vmul.f32 %v583_v25, %v1590_v20  ;;  %v1602_v32 = vpop.f32.mrf.mxu1  ;;  %v614_v24 = vmul.f32 0.5, %v1573_v5 }
 0x24c   : > { %1125 = vtanh.f32 %v662_v27  ;;  %v661_v33 = vmul.f32 0.7978846, %v645_v28  ;;  %v602_v34 = vmul.f32 %v1596_v26, %v586_v29  ;;  %v585_v35 = vmul.f32 %v1602_v32, %v1602_v32 }
 0x24d   : > { %v648_v36 = vadd.f32 %v1584_v14, %v632_v30  ;;  %v631_v37 = vmul.f32 0.044715, %v599_v31  ;;  %v1608_v38 = vpop.f32.mrf.mxu1 }
 0x24e   : > { %1127 = vtanh.f32 %v661_v33  ;;  %v634_v39 = vmul.f32 0.044715, %v602_v34  ;;  %v601_v40 = vmul.f32 %v585_v35, %v1602_v32  ;;  %v588_v41 = vmul.f32 %v1608_v38, %v1608_v38 }
 0x24f   : > { %v664_v42 = vmul.f32 0.7978846, %v648_v36  ;;  %v647_v43 = vadd.f32 %v631_v37, %v1590_v20  ;;  %v1614_v44 = vpop.f32.mrf.mxu1  ;;  %v613_v35 = vmul.f32 0.5, %v1578_v9 }
 0x250   : > { %v650_v45 = vadd.f32 %v1596_v26, %v634_v39  ;;  %v633_v46 = vmul.f32 0.044715, %v601_v40  ;;  %v604_v47 = vmul.f32 %v1608_v38, %v588_v41  ;;  %v587_v48 = vmul.f32 %v1614_v44, %v1614_v44 }
 0x251   : > { %1129 = vtanh.f32 %v664_v42  ;;  %v663_v49 = vmul.f32 0.7978846, %v647_v43  ;;  %v1620_v50 = vpop.f32.mrf.mxu1  ;;  %v616_v43 = vmul.f32 0.5, %v1584_v14 }
 0x252   : > { %v666_v51 = vmul.f32 0.7978846, %v650_v45  ;;  %v649_v52 = vadd.f32 %v633_v46, %v1602_v32  ;;  %v636_v53 = vmul.f32 0.044715, %v604_v47  ;;  %v603_v54 = vmul.f32 %v587_v48, %v1614_v44 }
 0x253   : > { %1131 = vtanh.f32 %v663_v49  ;;  %v590_v55 = vmul.f32 %v1620_v50, %v1620_v50  ;;  %v1626_v56 = vpop.f32.mrf.mxu1 }
 0x254   : > { %1133 = vtanh.f32 %v666_v51  ;;  %v665_v57 = vmul.f32 0.7978846, %v649_v52  ;;  %v652_v58 = vadd.f32 %v1608_v38, %v636_v53  ;;  %v635_v59 = vmul.f32 0.044715, %v603_v54 }
 0x255   : > { %v1122_v60 = vpop.eup %1121  ;;  %v606_v62 = vmul.f32 %v1620_v50, %v590_v55  ;;  %v589_v63 = vmul.f32 %v1626_v56, %v1626_v56  ;;  %v1633_v1 = vpop.f32.mrf.mxu1  ;;  %v615_v51 = vmul.f32 0.5, %v1590_v20  ;;  %v617_v20 = vmul.f32 0.5, %v1602_v32 }
 0x256   : > { %v692_v3 = vadd.f32 1.0, %v1122_v60  ;;  %1135 = vtanh.f32 %v665_v57  ;;  %v668_v4 = vmul.f32 0.7978846, %v652_v58  ;;  %v651_v6 = vadd.f32 %v635_v59, %v1614_v44 }
 0x257   : > { %v1124_v7 = vpop.eup %1123  ;;  %v638_v10 = vmul.f32 0.044715, %v606_v62  ;;  %v605_v11 = vmul.f32 %v589_v63, %v1626_v56  ;;  %v592_v0 = vmul.f32 %v1633_v1, %v1633_v1  ;;  %v1640_v12 = vpop.f32.mrf.mxu1  ;;  %v618_v58 = vmul.f32 0.5, %v1596_v26 }
 0x258   : > { %v708_v13 = vmul.f32 %v692_v3, %v612_v61  ;;  %v691_v15 = vadd.f32 1.0, %v1124_v7  ;;  %1137 = vtanh.f32 %v668_v4  ;;  %v667_v16 = vmul.f32 0.7978846, %v651_v6 }
 0x259   : > { %v1126_v17 = vpop.eup %1125  ;;  %v654_v18 = vadd.f32 %v1620_v50, %v638_v10  ;;  %v637_v19 = vmul.f32 0.044715, %v605_v11  ;;  %v608_v21 = vmul.f32 %v1633_v1, %v592_v0  ;;  %v591_v2 = vmul.f32 %v1640_v12, %v1640_v12  ;;  %v1646_v22 = vpop.f32.mrf.mxu1 }
 0x25a   : > { %724 = vst [vmem:[%s1649_s21 + $0x8] sm:$0xff] %v708_v13  ;;  %v707_v23 = vmul.f32 %v691_v15, %v611_v8  ;;  %v694_v25 = vadd.f32 1.0, %v1126_v17  ;;  %1139 = vtanh.f32 %v667_v16  ;;  %v594_v5 = vmul.f32 %v1646_v22, %v1646_v22 }
 0x25b   : > { %v1128_v27 = vpop.eup %1127  ;;  %v670_v28 = vmul.f32 0.7978846, %v654_v18  ;;  %v653_v29 = vadd.f32 %v637_v19, %v1626_v56  ;;  %v640_v30 = vmul.f32 0.044715, %v608_v21  ;;  %v607_v31 = vmul.f32 %v591_v2, %v1640_v12  ;;  %v1655_v33 = vpop.f32.mrf.mxu1 }
 0x25c   : > { %723 = vst [vmem:[%s1649_s21] sm:$0xff] %v707_v23  ;;  %v710_v34 = vmul.f32 %v694_v25, %v614_v24  ;;  %v693_v36 = vadd.f32 1.0, %v1128_v27  ;;  %v610_v45 = vmul.f32 %v1646_v22, %v594_v5  ;;  %v593_v9 = vmul.f32 %v1655_v33, %v1655_v33 }
 0x25d   : > { %1141 = vtanh.f32 %v670_v28  ;;  %v669_v37 = vmul.f32 0.7978846, %v653_v29  ;;  %v656_v39 = vadd.f32 %v1633_v1, %v640_v30  ;;  %v639_v40 = vmul.f32 0.044715, %v607_v31 }
 0x25e   : > { %v1130_v41 = vpop.eup %1129  ;;  %726 = vst [vmem:[%s1649_s21 + $0x18] sm:$0xff] %v710_v34  ;;  %v709_v42 = vmul.f32 %v693_v36, %v613_v35  ;;  %v642_v52 = vmul.f32 0.044715, %v610_v45  ;;  %v609_v53 = vmul.f32 %v593_v9, %v1655_v33  ;;  %v620_v26 = vmul.f32 0.5, %v1608_v38 }
 0x25f   : > { %v696_v46 = vadd.f32 1.0, %v1130_v41  ;;  %1143 = vtanh.f32 %v669_v37  ;;  %v672_v47 = vmul.f32 0.7978846, %v656_v39  ;;  %v655_v48 = vadd.f32 %v639_v40, %v1640_v12 }
 0x260   : > { %v1132_v49 = vpop.eup %1131  ;;  %725 = vst [vmem:[%s1649_s21 + $0x10] sm:$0xff] %v709_v42  ;;  %v658_v60 = vadd.f32 %v1646_v22, %v642_v52  ;;  %v641_v61 = vmul.f32 0.044715, %v609_v53  ;;  %v619_v15 = vmul.f32 0.5, %v1614_v44  ;;  %v622_v38 = vmul.f32 0.5, %v1620_v50 }
 0x261   : > { %v1134_v54 = vpop.eup %1133  ;;  %v712_v14 = vmul.f32 %v696_v46, %v616_v43  ;;  %v695_v55 = vadd.f32 1.0, %v1132_v49  ;;  %1145 = vtanh.f32 %v672_v47  ;;  %v671_v57 = vmul.f32 0.7978846, %v655_v48 }
 0x262   : > { %v698_v59 = vadd.f32 1.0, %v1134_v54  ;;  %v674_v6 = vmul.f32 0.7978846, %v658_v60  ;;  %v657_v7 = vadd.f32 %v641_v61, %v1655_v33  ;;  %v621_v23 = vmul.f32 0.5, %v1626_v56 }
 0x263   : > { %v1136_v62 = vpop.eup %1135  ;;  %728 = vst [vmem:[%s1649_s21 + $0x28] sm:$0xff] %v712_v14  ;;  %v711_v63 = vmul.f32 %v695_v55, %v615_v51  ;;  %1147 = vtanh.f32 %v671_v57  ;;  %v624_v27 = vmul.f32 0.5, %v1633_v1  ;;  %v623_v30 = vmul.f32 0.5, %v1640_v12 }
 0x264   : > { %v714_v3 = vmul.f32 %v698_v59, %v618_v58  ;;  %v697_v4 = vadd.f32 1.0, %v1136_v62  ;;  %1149 = vtanh.f32 %v674_v6  ;;  %v673_v0 = vmul.f32 0.7978846, %v657_v7 }
 0x265   : > { %v1138_v8 = vpop.eup %1137  ;;  %727 = vst [vmem:[%s1649_s21 + $0x20] sm:$0xff] %v711_v63  ;;  %v626_v35 = vmul.f32 0.5, %v1646_v22  ;;  %v625_v37 = vmul.f32 0.5, %v1655_v33 }
 0x266   : > { %730 = vst [vmem:[%s1649_s21 + $0x38] sm:$0xff] %v714_v3  ;;  %v713_v10 = vmul.f32 %v697_v4, %v617_v20  ;;  %v700_v11 = vadd.f32 1.0, %v1138_v8  ;;  %1151 = vtanh.f32 %v673_v0 }
 0x267   : > { %v1140_v13 = vpop.eup %1139 }
 0x268   : > { %729 = vst [vmem:[%s1649_s21 + $0x30] sm:$0xff] %v713_v10  ;;  %v716_v32 = vmul.f32 %v700_v11, %v620_v26  ;;  %v699_v16 = vadd.f32 1.0, %v1140_v13 }
 0x26a   : > { %v1142_v17 = vpop.eup %1141  ;;  %732 = vst [vmem:[%s1649_s21 + $0x48] sm:$0xff] %v716_v32  ;;  %v715_v18 = vmul.f32 %v699_v16, %v619_v15 }
 0x26b   : > { %v702_v19 = vadd.f32 1.0, %v1142_v17 }
 0x26c   : > { %v1144_v21 = vpop.eup %1143  ;;  %731 = vst [vmem:[%s1649_s21 + $0x40] sm:$0xff] %v715_v18 }
 0x26d   : > { %v718_v2 = vmul.f32 %v702_v19, %v622_v38  ;;  %v701_v24 = vadd.f32 1.0, %v1144_v21 }
 0x26e   : > { %v1146_v25 = vpop.eup %1145 }
 0x26f   : > { %734 = vst [vmem:[%s1649_s21 + $0x58] sm:$0xff] %v718_v2  ;;  %v717_v44 = vmul.f32 %v701_v24, %v621_v23  ;;  %v704_v28 = vadd.f32 1.0, %v1146_v25 }
 0x270   : > { %v1148_v29 = vpop.eup %1147 }
 0x271   : > { %733 = vst [vmem:[%s1649_s21 + $0x50] sm:$0xff] %v717_v44  ;;  %v720_v50 = vmul.f32 %v704_v28, %v624_v27  ;;  %v703_v31 = vadd.f32 1.0, %v1148_v29  ;;  %v1150_v34 = vpop.eup %1149 }
 0x272   : > { %v706_v36 = vadd.f32 1.0, %v1150_v34 }
 0x273   : > { %736 = vst [vmem:[%s1649_s21 + $0x68] sm:$0xff] %v720_v50  ;;  %v719_v56 = vmul.f32 %v703_v31, %v623_v30  ;;  %v1152_v1 = vpop.eup %1151 }
 0x274   : > { %v722_v5 = vmul.f32 %v706_v36, %v626_v35  ;;  %v705_v39 = vadd.f32 1.0, %v1152_v1 }
 0x275   : > { %735 = vst [vmem:[%s1649_s21 + $0x60] sm:$0xff] %v719_v56 }
 0x276   : > { %738 = vst [vmem:[%s1649_s21 + $0x78] sm:$0xff] %v722_v5  ;;  %v721_v12 = vmul.f32 %v705_v39, %v625_v37 }
 0x278   : > { %737 = vst [vmem:[%s1649_s21 + $0x70] sm:$0xff] %v721_v12 }
 0x279   : > { %1248 = shalt.err (!%p1245_p2)
}
 0x27a   : > { %s1249_s29 = scalar_lea.hbm %s1698_s28, 2048  ;;  %s1253_s7 = scalar_lea.hbm %s1750_s3, 4096 }
 0x27b   : > { %p1250_p7 = scmp.ne.s32.totalorder %s1698_s28, %s1249_s29  ;;  %p1254_p6 = scmp.lt.s32.totalorder %s1698_s28, %s1750_s3 }
 0x27c   : > { %p1255_p0 = scmp.lt.s32.totalorder %s1253_s7, %s1249_s29 }
 0x27d   : > { %p1251_p11 = pnand %p1250_p7, %p1764_p10 }
 0x27e   : > { %p1256_p13 = por %p1255_p0, %p1254_p6 }
 0x27f   : > { %p1252_p4 = pneg %p1251_p11 }
 0x281   : > { %p1257_p8 = pnand %p1256_p13, %p1252_p4 }
 0x283   : > { %1260 = shalt.err (!%p1257_p8)
}
 0x284   : > { %s1315_s24 = smov 128   ;;  %s1316_s20 = smov 8  }
 0x285   : > { %1063 = dma.vmem_to_hbm [thread:$0]  (%p1764_p10), %s1700_s8, 2048, %s1698_s28, %s1706_s27, %s1315_s24, %s1315_s24, %s1316_s20  }
 0x286 PF: > { %s768_s21 = sand.u32 1, %s1295_s12   ;;  %p1765_p9 = scmp.ne.s32.totalorder %s1757_s26, 0 }
 0x287   : > { %p1766_p3 = scmp.ge.s32.totalorder %s1307_s15, 2  ;;  %s769_s5 = scalar_lea.sflag [#allocation4], %s768_s21 }
 0x289   : > { %p1077_p1 = pnand %p1766_p3, %p1765_p9 }
 0x28b   : > { %p1078_p5 = pneg %p1077_p1 }
 0x28d   : > { %1290 = dma.done.wait (%p1078_p5), %s769_s5, 2048  }
 0x28e   : > { %1292 = vsyncadd (%p1078_p5), %s769_s5, 4294965248  ;;  %p17_p12 = scmp.ge.s32.totalorder %s1358_s16, 4   ;;  %s1767_s12 = smov %s1299_s13 }
 0x28f   : > { %s1768_s13 = smov %s1303_s14  ;;  %s1769_s14 = smov %s1367_s19 }
 0x290   : > { %s1770_s15 = smov %s1358_s16  ;;  %19 = sbr.rel (!%p17_p12) target bundleno = 6 (0x6), region = 92 }
 0x295   :  { %774 = vsyncpa [#allocation3], 1 }
 0x296   :  { %776 = vsyncpa [#allocation3 + $0x1], 1 }
 0x297   :  { %777 = vsyncpa [#allocation6], 1 }
 0x298   :  { %778 = vsyncpa [#allocation4], 1 }
 0x299   :  { %780 = vsyncpa [#allocation4 + $0x1], 1 }

</bundles_post_ra>
